<compile_context>
chip_gen: v7x
topology: tpu7x:2x2x1
jax: 0.10.0
libtpu: 0.0.40
codegen_flags: <defaults>
</compile_context>

<pallas_src>
from functools import partial
import math

import jax
import jax.numpy as jnp
from jax.experimental import pallas as pl
from jax.experimental.pallas import tpu as pltpu


_TARGET_BLOCK_BYTES = 4 << 20     # per input block (Pallas double-buffers it)
_MIN_BLOCK_BYTES = 512 << 10      # don't shrink blocks below this just to split the grid
_MIN_GRID_STEPS = 8               # keep both v7x TensorCores / the pipeline fed


def _sublane_pack(dtype) -> int:
    """Sublane packing: 8 for 32-bit, 16 for bf16/f16, 32 for int8/fp8."""
    bits = jnp.dtype(dtype).itemsize * 8
    return max(8, 256 // bits)


def _round_up(a: int, m: int) -> int:
    return -(-a // m) * m


# ---------------------------------------------------------------------------
# Kernels
# ---------------------------------------------------------------------------

def _maxout_strided_kernel(x_ref, o_ref, *, pool_size):
    # x_ref: (tile_n, tile_f) lane-dense VMEM block.  Element k of output pool j
    # sits at lane j*pool_size + k, so the pool reduction is a small unrolled
    # loop of lane-strided loads followed by pure-VPU maxima.
    ow = o_ref.shape[-1]                       # static: tile_f // pool_size
    m = x_ref[:, pl.ds(0, ow, stride=pool_size)]
    for k in range(1, pool_size):
        m = jnp.maximum(m, x_ref[:, pl.ds(k, ow, stride=pool_size)])
    o_ref[...] = m


def _maxout_pool_major_kernel(x_ref, o_ref):
    # Fallback layout: x_ref is (pool_size, tile_n, tile_ow); elementwise max
    # over the (statically unrolled) leading pool axis.
    p = x_ref.shape[0]
    m = x_ref[0]
    for k in range(1, p):
        m = jnp.maximum(m, x_ref[k])
    o_ref[...] = m


# ---------------------------------------------------------------------------
# Tiling / VMEM helpers
# ---------------------------------------------------------------------------

def _choose_tiles(R, W, pool_size, itemsize, pack):
    """Pick (tile_n, tile_f): (8,128)-or-full-dim legal, ~4 MiB input blocks."""
    unit = 128 * pool_size
    # Lane tile: full W when `pack` rows of it fit the budget, else a multiple
    # of 128*pool_size (keeps pools intact AND keeps the output tile a multiple
    # of 128 lanes).  This is the v7x escape hatch for very wide rows.
    if W * itemsize * pack <= _TARGET_BLOCK_BYTES or W < unit:
        tile_f = W
    else:
        tile_f = max(unit, (_TARGET_BLOCK_BYTES // (pack * itemsize)) // unit * unit)
        tile_f = min(tile_f, max(unit, (W // unit) * unit))
    grid_f = pl.cdiv(W, tile_f)

    row_bytes = tile_f * itemsize
    if R <= pack:
        tile_n = R                                               # full dim
    else:
        tile_n = max(pack, min((_TARGET_BLOCK_BYTES // row_bytes) // pack * pack,
                               (R // pack) * pack))
        # Prefer >= ~8 total grid steps while blocks stay reasonably big.
        want_row_steps = -(-_MIN_GRID_STEPS // grid_f)
        split = _round_up(pl.cdiv(R, want_row_steps), pack)
        if split * row_bytes >= _MIN_BLOCK_BYTES:
            tile_n = max(pack, min(tile_n, split))
    return tile_n, tile_f


def _vmem_limit_bytes(tile_n, tile_f, pool_size, itemsize):
    in_bytes = tile_n * tile_f * itemsize
    out_bytes = tile_n * (tile_f // pool_size) * itemsize
    # Double-buffered in+out plus headroom for compiler-internal scratch.
    # Stays far below v7x's 64 MiB physical VMEM (128 MiB on v5e/v6e).
    return int(max(16 << 20, 2 * (in_bytes + out_bytes) + (8 << 20)))


# ---------------------------------------------------------------------------
# pallas_call wrappers
# ---------------------------------------------------------------------------

def _call_strided(x2, pool_size, tile_n, tile_f):
    R, W = x2.shape
    ow = W // pool_size
    tow = tile_f // pool_size
    itemsize = jnp.dtype(x2.dtype).itemsize
    grid = (pl.cdiv(R, tile_n), pl.cdiv(W, tile_f))
    return pl.pallas_call(
        partial(_maxout_strided_kernel, pool_size=pool_size),
        out_shape=jax.ShapeDtypeStruct((R, ow), x2.dtype),
        grid=grid,
        in_specs=[pl.BlockSpec((tile_n, tile_f), lambda i, j: (i, j))],
        out_specs=pl.BlockSpec((tile_n, tow), lambda i, j: (i, j)),
        compiler_params=pltpu.CompilerParams(
            # Both axes independent -> "parallel" lets Mosaic shard the grid
            # across v7x's two TensorCores (no-op on single-TC v5e/v6e).
            dimension_semantics=("parallel", "parallel"),
            vmem_limit_bytes=_vmem_limit_bytes(tile_n, tile_f, pool_size, itemsize),
        ),
    )(x2)


def _call_pool_major(x2, pool_size, tile_n, tile_f):
    # TODO(synk): last-resort path only — the XLA transpose below materializes
    # a (pool, R, ow) copy in HBM (~2x traffic).  It is taken only when the
    # one-time probe finds that lane-strided VMEM loads do not lower.
    R, W = x2.shape
    ow = W // pool_size
    tow = tile_f // pool_size
    itemsize = jnp.dtype(x2.dtype).itemsize
    xr = x2.reshape(R, ow, pool_size).transpose(2, 0, 1)        # (pool, R, ow)
    grid = (pl.cdiv(R, tile_n), pl.cdiv(ow, tow))
    return pl.pallas_call(
        _maxout_pool_major_kernel,
        out_shape=jax.ShapeDtypeStruct((R, ow), x2.dtype),
        grid=grid,
        in_specs=[pl.BlockSpec((pool_size, tile_n, tow), lambda i, j: (0, i, j))],
        out_specs=pl.BlockSpec((tile_n, tow), lambda i, j: (i, j)),
        compiler_params=pltpu.CompilerParams(
            dimension_semantics=("parallel", "parallel"),
            vmem_limit_bytes=_vmem_limit_bytes(tile_n, tile_f, pool_size, itemsize),
        ),
    )(xr)


# ---------------------------------------------------------------------------
# One-time capability probe (chooses the code path statically)
# ---------------------------------------------------------------------------

_LANE_STRIDED_OK = {}   # (pool_size, dtype name) -> bool


def _lane_strided_supported(pool_size, dtype):
    key = (int(pool_size), jnp.dtype(dtype).name)
    hit = _LANE_STRIDED_OK.get(key)
    if hit is not None:
        return hit
    ok = False
    try:
        w = 128 * int(pool_size)
        probe = (jnp.arange(8 * w, dtype=jnp.float32) % 13.0).astype(dtype)
        probe = probe.reshape(8, w)
        got = pl.pallas_call(
            partial(_maxout_strided_kernel, pool_size=int(pool_size)),
            out_shape=jax.ShapeDtypeStruct((8, 128), probe.dtype),
            grid=(1, 1),
            in_specs=[pl.BlockSpec((8, w), lambda i, j: (i, j))],
            out_specs=pl.BlockSpec((8, 128), lambda i, j: (i, j)),
        )(probe)
        ref = jnp.max(probe.reshape(8, 128, int(pool_size)), axis=-1)
        ok = bool(jnp.array_equal(jax.block_until_ready(got), ref))
    except Exception:
        # Lowering/compile failure on this toolchain -> use the pool-major path.
        ok = False
    _LANE_STRIDED_OK[key] = ok
    return ok


# ---------------------------------------------------------------------------
# Public wrapper (forward pass of the PyTorch Maxout module)
# ---------------------------------------------------------------------------

def maxout(x, pool_size):
    *lead, f = x.shape
    if f % pool_size != 0:
        raise ValueError(f"last dim {f} must be divisible by pool_size {pool_size}")
    out_f = f // pool_size
    if x.size == 0:
        return jnp.zeros((*lead, out_f), x.dtype)

    n = math.prod(lead) if lead else 1
    total = n * f
    itemsize = jnp.dtype(x.dtype).itemsize
    pack = _sublane_pack(x.dtype)

    # Pools are contiguous in the flat row-major stream, so any (R, W) re-view
    # with W % pool_size == 0 keeps pools intact (metadata-only, no HBM copy).
    # Pick W a multiple of 128*pool_size when possible so the output tile is a
    # multiple of 128 lanes -> unmasked, lane-dense stores.
    unit = 128 * pool_size
    if total % unit == 0:
        q = total // unit
        max_c = max(1, min(q, 16))              # output rows up to 2048 lanes wide
        c = 1
        for cand in range(max_c, 0, -1):
            if q % cand == 0 and (q // cand >= _MIN_GRID_STEPS or cand == 1):
                c = cand
                break
        W = c * unit
    else:
        W = f                                   # rare: output may be lane-starved
    R = total // W

    x2 = x.reshape(R, W)                        # metadata-only re-view
    tile_n, tile_f = _choose_tiles(R, W, pool_size, itemsize, pack)

    if _lane_strided_supported(pool_size, x.dtype):
        out = _call_strided(x2, pool_size, tile_n, tile_f)
    else:
        out = _call_pool_major(x2, pool_size, tile_n, tile_f)

    return out.reshape(*lead, out_f)


if __name__ == "__main__":
    # Shapes consistent with the module's use in the seq2seq predictor:
    # batch=2, seq=8, hidden=32, pool=4.  (Maxout has no learnable parameters.)
    pool_size = 4
    key = jax.random.PRNGKey(0)

    x = jax.random.normal(key, (2, 8, 32), dtype=jnp.float32)
    y = jax.block_until_ready(maxout(x, pool_size))
    ref = jnp.max(x.reshape(2, 8, 32 // pool_size, pool_size), axis=-1)
    assert y.shape == ref.shape == (2, 8, 8)
    assert jnp.array_equal(y, ref), "mismatch vs reference maxout (f32)"

    # bf16 with sizes that miss the 128*pool lane-dense re-view: exercises the
    # (N, F) working shape and the ragged/full-dim block handling.
    x2 = jax.random.normal(jax.random.PRNGKey(0), (3, 5, 32), dtype=jnp.bfloat16)
    y2 = jax.block_until_ready(maxout(x2, pool_size))
    ref2 = jnp.max(x2.reshape(3, 5, 8, pool_size), axis=-1)
    assert y2.shape == (3, 5, 8)
    assert jnp.array_equal(y2, ref2), "mismatch vs reference maxout (bf16)"

    print("KERNEL_OK")
</pallas_src>

<mosaic_0001>
module attributes {stable_mosaic.version = 11 : i64} {
  func.func @_maxout_strided_kernel(%arg0: i32, %arg1: i32, %arg2: memref<8x512xf32, #tpu.memory_space<vmem>>, %arg3: memref<8x128xf32, #tpu.memory_space<vmem>>) attributes {dimension_semantics = [#tpu.dimension_semantics<arbitrary>, #tpu.dimension_semantics<arbitrary>], iteration_bounds = array<i64: 1, 1>, scalar_prefetch = 0 : i64, scratch_operands = 0 : i64, tpu.core_type = #tpu.core_type<tc>, window_params = [{transform_indices = @transform_0, window_bounds = array<i64: 8, 512>}, {transform_indices = @transform_1, window_bounds = array<i64: 8, 128>}]} {
    %c0 = arith.constant 0 : index
    %c0_0 = arith.constant 0 : index
    %0 = tpu.strided_load %arg2[%c0, %c0_0] {strides = array<i32: 1, 4>} : memref<8x512xf32, #tpu.memory_space<vmem>>, vector<8x128xf32>
    %c0_1 = arith.constant 0 : index
    %c1 = arith.constant 1 : index
    %1 = tpu.strided_load %arg2[%c0_1, %c1] {strides = array<i32: 1, 4>} : memref<8x512xf32, #tpu.memory_space<vmem>>, vector<8x128xf32>
    %2 = arith.maximumf %0, %1 : vector<8x128xf32>
    %c0_2 = arith.constant 0 : index
    %c2 = arith.constant 2 : index
    %3 = tpu.strided_load %arg2[%c0_2, %c2] {strides = array<i32: 1, 4>} : memref<8x512xf32, #tpu.memory_space<vmem>>, vector<8x128xf32>
    %4 = arith.maximumf %2, %3 : vector<8x128xf32>
    %c0_3 = arith.constant 0 : index
    %c3 = arith.constant 3 : index
    %5 = tpu.strided_load %arg2[%c0_3, %c3] {strides = array<i32: 1, 4>} : memref<8x512xf32, #tpu.memory_space<vmem>>, vector<8x128xf32>
    %6 = arith.maximumf %4, %5 : vector<8x128xf32>
    %c0_4 = arith.constant 0 : index
    %c0_5 = arith.constant 0 : index
    %7 = vector.load %arg3[%c0_4, %c0_5] : memref<8x128xf32, #tpu.memory_space<vmem>>, vector<8x128xf32>
    tpu.vector_store %arg3[%c0_4, %c0_5], %6 {strides = array<i32>} : memref<8x128xf32, #tpu.memory_space<vmem>>, vector<8x128xf32>,
    return
  }
  func.func @transform_0(%arg0: i32, %arg1: i32) -> (i32, i32) {
    %c0_i32 = arith.constant 0 : i32
    return %arg0, %arg1 : i32, i32
  }
  func.func @transform_1(%arg0: i32, %arg1: i32) -> (i32, i32) {
    %c0_i32 = arith.constant 0 : i32
    return %arg0, %arg1 : i32, i32
  }
}

module attributes {stable_mosaic.version = 11 : i64} {
  func.func @_maxout_pool_major_kernel(%arg0: i32, %arg1: i32, %arg2: memref<4x1x128xf32, #tpu.memory_space<vmem>>, %arg3: memref<1x128xf32, #tpu.memory_space<vmem>>) attributes {dimension_semantics = [#tpu.dimension_semantics<parallel>, #tpu.dimension_semantics<parallel>], iteration_bounds = array<i64: 1, 1>, scalar_prefetch = 0 : i64, scratch_operands = 0 : i64, tpu.core_type = #tpu.core_type<tc>, window_params = [{transform_indices = @transform_0, window_bounds = array<i64: 4, 1, 128>}, {transform_indices = @transform_1, window_bounds = array<i64: 1, 128>}]} {
    %c0 = arith.constant 0 : index
    %c0_0 = arith.constant 0 : index
    %c0_1 = arith.constant 0 : index
    %0 = vector.load %arg2[%c0, %c0_0, %c0_1] : memref<4x1x128xf32, #tpu.memory_space<vmem>>, vector<1x1x128xf32>
    %1 = vector.shape_cast %0 : vector<1x1x128xf32> to vector<1x128xf32>
    %c1 = arith.constant 1 : index
    %c0_2 = arith.constant 0 : index
    %c0_3 = arith.constant 0 : index
    %2 = vector.load %arg2[%c1, %c0_2, %c0_3] : memref<4x1x128xf32, #tpu.memory_space<vmem>>, vector<1x1x128xf32>
    %3 = vector.shape_cast %2 : vector<1x1x128xf32> to vector<1x128xf32>
    %4 = arith.maximumf %1, %3 : vector<1x128xf32>
    %c2 = arith.constant 2 : index
    %c0_4 = arith.constant 0 : index
    %c0_5 = arith.constant 0 : index
    %5 = vector.load %arg2[%c2, %c0_4, %c0_5] : memref<4x1x128xf32, #tpu.memory_space<vmem>>, vector<1x1x128xf32>
    %6 = vector.shape_cast %5 : vector<1x1x128xf32> to vector<1x128xf32>
    %7 = arith.maximumf %4, %6 : vector<1x128xf32>
    %c3 = arith.constant 3 : index
    %c0_6 = arith.constant 0 : index
    %c0_7 = arith.constant 0 : index
    %8 = vector.load %arg2[%c3, %c0_6, %c0_7] : memref<4x1x128xf32, #tpu.memory_space<vmem>>, vector<1x1x128xf32>
    %9 = vector.shape_cast %8 : vector<1x1x128xf32> to vector<1x128xf32>
    %10 = arith.maximumf %7, %9 : vector<1x128xf32>
    %c0_8 = arith.constant 0 : index
    %c0_9 = arith.constant 0 : index
    %11 = vector.load %arg3[%c0_8, %c0_9] : memref<1x128xf32, #tpu.memory_space<vmem>>, vector<1x128xf32>
    tpu.vector_store %arg3[%c0_8, %c0_9], %10 {strides = array<i32>} : memref<1x128xf32, #tpu.memory_space<vmem>>, vector<1x128xf32>,
    return
  }
  func.func @transform_0(%arg0: i32, %arg1: i32) -> (i32, i32, i32) {
    %c0_i32 = arith.constant 0 : i32
    %c0_i32_0 = arith.constant 0 : i32
    return %c0_i32, %arg0, %arg1 : i32, i32, i32
  }
  func.func @transform_1(%arg0: i32, %arg1: i32) -> (i32, i32) {
    %c0_i32 = arith.constant 0 : i32
    return %arg0, %arg1 : i32, i32
  }
}

</mosaic_0001>

<bundles_post_ra>
// kernel: tpu_custom_call.1
= control target key start
LH: loop header
LB: loop body
LE: loop exit
PB: predicated region body
PF: predicated region fallthrough
CT: control target
= control target key end

     0   :  { %6 = vsyncpa [#allocation3], 0  ;;  %s139_s0 = inlined_call_operand.hbm [shape: f32[4,1,128], index: 0, kind: input, shape index: {}]   ;;  %s140_s1 = inlined_call_operand.hbm [shape: f32[1,128], index: 1, kind: output, shape index: {}]  }
   0x1   :  { %7 = vsyncpa [#allocation4], 0  ;;  %s101_s6 = smov [#allocation2]   ;;  %s53_s10 = scalar_lea.hbm %s139_s0, 64 }
   0x2   :  { %s13_s7 = sshll.u32 %s101_s6, 4  ;;  %p54_p0 = scmp.ne.s32.totalorder %s139_s0, %s53_s10  ;;  %s14_s7 = int_to_ptr.vmem [resolvable:$true] %s13_s7 }
   0x3   :  { %p57_p1 = scmp.lt.u32.totalorder %s53_s10, %s139_s0 }
   0x5   :  { %p59_p2 = pnand %p57_p1, %p54_p0 }
   0x7   :  { %62 = shalt.err (!%p59_p2)
}
   0x8   :  { %s63_s15 = scalar_lea.vmem %s14_s7, 64  ;;  %p68_p4 = scmp.lt.s32.totalorder %s14_s7, %s14_s7 }
   0x9   :  { %p64_p3 = scmp.ne.s32.totalorder %s14_s7, %s63_s15  ;;  %p69_p5 = scmp.lt.s32.totalorder %s63_s15, %s63_s15 }
   0xb   :  { %p70_p6 = por %p69_p5, %p68_p4 }
   0xd   :  { %p71_p7 = pnand %p70_p6, %p64_p3 }
   0xf   :  { %74 = shalt.err (!%p71_p7)
}
  0x10   :  { %s102_s16 = smov 16   ;;  %s103_s17 = smov 1  }
  0x11   :  { %19 = dma.hbm_to_vmem [thread:$0]  %s139_s0, 64, %s14_s7, [#allocation3], %s102_s16, %s102_s16, %s103_s17  }
  0x12   :  { %97 = dma.done.wait [#allocation3], 64  }
  0x13   :  { %98 = vsyncadd [#allocation3], 4294967232  ;;  %v23_v0 = vld [vmem:[#allocation2] sm:$0x1]  ;;  %v25_v1 = vld [vmem:[#allocation2 + $0x1] sm:$0x1] }
  0x14   :  { %v28_v2 = vld [vmem:[#allocation2 + $0x2] sm:$0x1]  ;;  %v26_v3 = vmax.f32 %v23_v0, %v25_v1  ;;  %v31_v4 = vld [vmem:[#allocation2 + $0x3] sm:$0x1]  ;;  %s104_s20 = smov [#allocation5]  }
  0x15   :  { %s40_s21 = sshll.u32 %s104_s20, 4  ;;  %s41_s21 = int_to_ptr.vmem [resolvable:$true] %s40_s21 }
  0x16   :  { %v29_v5 = vmax.f32 %v26_v3, %v28_v2  ;;  %s75_s22 = scalar_lea.vmem %s41_s21, 16  ;;  %s79_s23 = scalar_lea.vmem %s41_s21, 32 }
  0x17   :  { %p76_p8 = scmp.ne.s32.totalorder %s41_s21, %s75_s22  ;;  %p80_p9 = scmp.lt.s32.totalorder %s41_s21, %s41_s21 }
  0x18   :  { %v32_v6 = vmax.f32 %v29_v5, %v31_v4  ;;  %p81_p10 = scmp.lt.s32.totalorder %s79_s23, %s75_s22 }
  0x1a   :  { %33 = vst [vmem:[#allocation5] sm:$0x1] %v32_v6  ;;  %p82_p11 = por %p81_p10, %p80_p9 }
  0x1c   :  { %p83_p12 = pnand %p82_p11, %p76_p8 }
  0x1e   :  { %86 = shalt.err (!%p83_p12)
}
  0x1f   :  { %s87_s25 = scalar_lea.hbm %s140_s1, 16 }
  0x20   :  { %p88_p13 = scmp.ne.s32.totalorder %s140_s1, %s87_s25  ;;  %p91_p0 = scmp.lt.u32.totalorder %s87_s25, %s140_s1 }
  0x22   :  { %p93_p1 = pnand %p91_p0, %p88_p13 }
  0x24   :  { %96 = shalt.err (!%p93_p1)
}
  0x25   :  { %43 = dma.vmem_to_hbm [thread:$0]  %s41_s21, 16, %s140_s1, [#allocation4]  }
  0x26   :  { %99 = dma.done.wait [#allocation4], 16  }
  0x27   :  { %100 = vsyncadd [#allocation4], 4294967280 }
  0x28   :  { %47 = vsyncpa [#allocation3], 1 }
  0x29   :  { %48 = vsyncpa [#allocation4], 1 }

</bundles_post_ra>
